<compile_context>
chip_gen: v7x
topology: tpu7x:2x2x1
jax: 0.10.0
libtpu: 0.0.40
codegen_flags: <defaults>
</compile_context>

<pallas_src>
import functools

import numpy as np
import jax
import jax.numpy as jnp
from jax.experimental import pallas as pl
from jax.experimental.pallas import tpu as pltpu


# --------------------------------------------------------------------------
# Kernel
# --------------------------------------------------------------------------
def _edge_map_kernel(inv_scale_ref, w_ref, x_ref, o_ref, dx_ref, dy_ref, *,
                     row_stride: int):
    """One (batch-block, channel) grid step.

    inv_scale_ref: (1, 1) f32 in SMEM, holds 1/|scale|.
    w_ref:         (4, HW) bf16 border masks [wax, wbx, way, wby] in {0,0.5,1}.
    x_ref:         (tn, HW) input slab of the current channel (C dim squeezed).
    o_ref:         (tn, HW) output block (resident across the channel axis).
    dx_ref/dy_ref: (tn, HW) f32 scratch accumulators.
    """
    c = pl.program_id(1)
    hw = x_ref.shape[-1]

    @pl.when(c == 0)
    def _():
        dx_ref[...] = jnp.zeros_like(dx_ref)
        dy_ref[...] = jnp.zeros_like(dy_ref)

    xc = x_ref[...].astype(jnp.float32)
    # roll by (hw - k) == x[i + k] at position i.  Wrapped elements are killed
    # by the zero entries of the border masks below.  (When W % 128 == 0 the
    # roll by W is a whole-vreg lane shift -> low XLU cost.)
    dx_ref[...] += jnp.abs(pltpu.roll(xc, hw - row_stride, axis=1) - xc)
    dy_ref[...] += jnp.abs(pltpu.roll(xc, hw - 1, axis=1) - xc)

    @pl.when(c == pl.num_programs(1) - 1)
    def _():
        dx = dx_ref[...]
        dy = dy_ref[...]
        w = w_ref[...].astype(jnp.float32)            # (4, HW)
        # edge[i] = wax*dx[i] + wbx*dx[i-W] + way*dy[i] + wby*dy[i-1], /|scale|
        edge = (w[0:1, :] * dx
                + w[1:2, :] * pltpu.roll(dx, row_stride, axis=1)
                + w[2:3, :] * dy
                + w[3:4, :] * pltpu.roll(dy, 1, axis=1))
        o_ref[...] = (edge * inv_scale_ref[0, 0]).astype(o_ref.dtype)


# --------------------------------------------------------------------------
# Border masks (scale independent, cached per (H, W), bf16-exact values)
# --------------------------------------------------------------------------
_MASK_CACHE = {}


def _border_masks(H: int, W: int) -> np.ndarray:
    hw = H * W
    h = np.arange(hw, dtype=np.int64) // W
    w = np.arange(hw, dtype=np.int64) % W
    fx = np.where((h >= 1) & (h <= H - 2), 0.5, 1.0)
    fy = np.where((w >= 1) & (w <= W - 2), 0.5, 1.0)
    wax = fx * (h <= H - 2)
    wbx = fx * (h >= 1)
    way = fy * (w <= W - 2)
    wby = fy * (w >= 1)
    return np.stack([wax, wbx, way, wby])


def _get_masks(H: int, W: int) -> jax.Array:
    key = (H, W)
    m = _MASK_CACHE.get(key)
    if m is None:
        # {0, 0.5, 1} are exact in bf16; halves mask HBM/VMEM vs f32.
        m = jnp.asarray(_border_masks(H, W), dtype=jnp.bfloat16)
        _MASK_CACHE[key] = m
    return m


# --------------------------------------------------------------------------
# Tiling / VMEM sizing
# --------------------------------------------------------------------------
def _ceil_to(x: int, m: int) -> int:
    return -(-x // m) * m


def _block_vmem_bytes(tn: int, hw: int, in_isz: int, out_isz: int) -> int:
    """Conservative per-step VMEM footprint, including sublane/lane padding."""
    tn_p = max(8, _ceil_to(tn, 8))       # sublane padding of (tn, HW) buffers
    hw_p = _ceil_to(hw, 128)             # lane padding
    inp = 2 * tn_p * hw_p * in_isz       # double-buffered input block
    out = 2 * tn_p * hw_p * out_isz      # double-buffered output block
    scr = 2 * tn_p * hw_p * 4            # dx / dy scratch accumulators
    tmp = 6 * tn_p * hw_p * 4            # xc, rolled copies, |diff|s, edge
    wts = 2 * 16 * hw_p * 2              # bf16 masks (4 rows pad to 16 sublanes)
    return inp + out + scr + tmp + wts


def _vmem_caps() -> tuple[int, int]:
    """(physical VMEM capacity, budget for our blocks), generation aware."""
    try:
        cap = int(pltpu.get_tpu_info().vmem_capacity_bytes)
    except Exception:
        cap = 64 << 20                   # conservative (v7x-class) fallback
    budget = (40 << 20) if cap <= (64 << 20) else (64 << 20)
    return cap, budget


def _choose_tn(N: int, hw: int, in_isz: int, out_isz: int, budget: int) -> int:
    # >= 4 batch blocks when N allows (restores pipelining overlap) and >= 2
    # when N > 1 (v7x megacore split of the "parallel" batch axis).
    want_blocks = min(N, 4)
    tn = max(1, pl.cdiv(N, want_blocks))
    while tn > 1 and _block_vmem_bytes(tn, hw, in_isz, out_isz) > budget:
        tn = max(1, tn // 2)
    if tn >= 8:
        tn = (tn // 8) * 8               # sublane-aligned, denser stores
    # TODO(synk): when even tn == 1 exceeds the budget (huge single images),
    # switch to an H-tile with a one-row (W element) halo instead.
    return int(tn)


# --------------------------------------------------------------------------
# Wrapper
# --------------------------------------------------------------------------
def edge_map(img: jax.Array, scale: float = 1.0) -> jax.Array:
    """Pallas implementation of EdgeMap.forward. img: (N,C,H,W) -> (N,1,H,W)."""
    if float(scale) == 0.0:
        raise ValueError("EdgeMap: scale must be non-zero")
    N, C, H, W = img.shape
    HW = H * W
    in_isz = jnp.dtype(img.dtype).itemsize
    out_isz = in_isz

    cap, budget = _vmem_caps()
    tn = _choose_tn(N, HW, in_isz, out_isz, budget)
    need = _block_vmem_bytes(tn, HW, in_isz, out_isz)
    vmem_limit = int(min(max(budget, need + (4 << 20)), cap - (8 << 20)))

    grid = (pl.cdiv(N, tn), C)           # (parallel batch blocks, channels)

    masks = _get_masks(H, W)                                       # (4, HW) bf16
    inv_scale = jnp.full((1, 1), 1.0 / abs(float(scale)), jnp.float32)
    # Dummy size-1 axes before the lane axis so every block's last two dims
    # equal the full array dims (always layout-legal); reshapes are free.
    x = img.reshape(N, C, 1, HW)

    out = pl.pallas_call(
        functools.partial(_edge_map_kernel, row_stride=W),
        out_shape=jax.ShapeDtypeStruct((N, 1, HW), img.dtype),
        grid_spec=pltpu.PrefetchScalarGridSpec(
            num_scalar_prefetch=0,
            grid=grid,
            in_specs=[
                # 1/|scale| scalar, whole array in SMEM.
                pl.BlockSpec(memory_space=pltpu.MemorySpace.SMEM),
                # Border masks: constant block index -> fetched once, reused.
                pl.BlockSpec((4, HW), lambda n, c: (0, 0)),
                # Per-channel slab: batch tile on leading dim, channel squeezed,
                # kernel sees a dense (tn, HW) buffer (tn sublanes, HW lanes).
                pl.BlockSpec((tn, None, None, HW), lambda n, c: (n, c, 0, 0)),
            ],
            out_specs=pl.BlockSpec((tn, None, HW), lambda n, c: (n, 0, 0)),
            scratch_shapes=[pltpu.VMEM((tn, HW), jnp.float32),
                            pltpu.VMEM((tn, HW), jnp.float32)],
        ),
        compiler_params=pltpu.CompilerParams(
            dimension_semantics=("parallel", "arbitrary"),
            vmem_limit_bytes=vmem_limit),
    )(inv_scale, masks, x)
    return out.reshape(N, 1, H, W)


# --------------------------------------------------------------------------
# Pure-JAX reference mirroring the PyTorch forward
# --------------------------------------------------------------------------
def _edge_map_ref(img, scale=1.0):
    x = img / scale
    N, C, H, W = x.shape
    gradx = jnp.sum(jnp.abs(x[..., 1:, :] - x[..., :-1, :]), axis=1,
                    keepdims=True)
    grady = jnp.sum(jnp.abs(x[..., 1:] - x[..., :-1]), axis=1, keepdims=True)
    gradX = jnp.zeros((N, 1, H, W), dtype=x.dtype)
    gradY = jnp.zeros((N, 1, H, W), dtype=x.dtype)
    gradX = gradX.at[..., :-1, :].add(gradx)
    gradX = gradX.at[..., 1:, :].add(gradx)
    gradX = gradX.at[..., 1:-1, :].divide(2)
    gradY = gradY.at[..., :-1].add(grady)
    gradY = gradY.at[..., 1:].add(grady)
    gradY = gradY.at[..., 1:-1].divide(2)
    return gradX + gradY


if __name__ == "__main__":
    key = jax.random.PRNGKey(0)
    N, C, H, W = 2, 4, 16, 16
    img = jax.random.uniform(key, (N, C, H, W), dtype=jnp.float32)

    out = jax.block_until_ready(edge_map(img, scale=1.0))
    ref = _edge_map_ref(img, scale=1.0)
    assert out.shape == (N, 1, H, W), out.shape
    assert out.dtype == img.dtype, out.dtype
    assert jnp.allclose(out, ref, atol=1e-5, rtol=1e-5), "mismatch (scale=1)"

    out2 = jax.block_until_ready(edge_map(img, scale=2.0))
    ref2 = _edge_map_ref(img, scale=2.0)
    assert jnp.allclose(out2, ref2, atol=1e-5, rtol=1e-5), "mismatch (scale=2)"

    print("KERNEL_OK")
</pallas_src>

<mosaic_0001>
module attributes {stable_mosaic.version = 11 : i64} {
  func.func @_edge_map_kernel(%arg0: i32, %arg1: i32, %arg2: memref<1x1xf32, #tpu.memory_space<smem>>, %arg3: memref<4x256xbf16, #tpu.memory_space<vmem>>, %arg4: memref<1x1x1x256xf32, #tpu.memory_space<vmem>>, %arg5: memref<1x1x256xf32, #tpu.memory_space<vmem>>, %arg6: memref<1x256xf32, #tpu.memory_space<vmem>>, %arg7: memref<1x256xf32, #tpu.memory_space<vmem>>) attributes {dimension_semantics = [#tpu.dimension_semantics<parallel>, #tpu.dimension_semantics<arbitrary>], iteration_bounds = array<i64: 2, 4>, scalar_prefetch = 0 : i64, scratch_operands = 2 : i64, tpu.core_type = #tpu.core_type<tc>, window_params = [{transform_indices = @transform_0, window_bounds = array<i64: 1, 1>}, {pipeline_mode = #tpu.pipeline_mode<synchronous>, transform_indices = @transform_1, window_bounds = array<i64: 4, 256>}, {transform_indices = @transform_2, window_bounds = array<i64: 1, 1, 1, 256>}, {transform_indices = @transform_3, window_bounds = array<i64: 1, 1, 256>}]} {
    %c0_i32 = arith.constant 0 : i32
    %0 = arith.cmpi eq, %arg1, %c0_i32 : i32
    %1 = arith.extui %0 : i1 to i32
    %c0_i32_0 = arith.constant 0 : i32
    %2 = arith.cmpi ne, %1, %c0_i32_0 : i32
    scf.if %2 {
      %cst = arith.constant 0.000000e+00 : f32
      %20 = vector.broadcast %cst : f32 to vector<1x256xf32>
      %c0_13 = arith.constant 0 : index
      %c0_14 = arith.constant 0 : index
      %21 = vector.load %arg6[%c0_13, %c0_14] : memref<1x256xf32, #tpu.memory_space<vmem>>, vector<1x256xf32>
      tpu.vector_store %arg6[%c0_13, %c0_14], %20 {strides = array<i32>} : memref<1x256xf32, #tpu.memory_space<vmem>>, vector<1x256xf32>,
      %cst_15 = arith.constant 0.000000e+00 : f32
      %22 = vector.broadcast %cst_15 : f32 to vector<1x256xf32>
      %c0_16 = arith.constant 0 : index
      %c0_17 = arith.constant 0 : index
      %23 = vector.load %arg7[%c0_16, %c0_17] : memref<1x256xf32, #tpu.memory_space<vmem>>, vector<1x256xf32>
      tpu.vector_store %arg7[%c0_16, %c0_17], %22 {strides = array<i32>} : memref<1x256xf32, #tpu.memory_space<vmem>>, vector<1x256xf32>,
    } else {
    }
    %c0 = arith.constant 0 : index
    %c0_1 = arith.constant 0 : index
    %c0_2 = arith.constant 0 : index
    %c0_3 = arith.constant 0 : index
    %3 = vector.load %arg4[%c0, %c0_1, %c0_2, %c0_3] : memref<1x1x1x256xf32, #tpu.memory_space<vmem>>, vector<1x1x1x256xf32>
    %4 = vector.shape_cast %3 : vector<1x1x1x256xf32> to vector<1x256xf32>
    %c0_4 = arith.constant 0 : index
    %c0_5 = arith.constant 0 : index
    %5 = vector.load %arg6[%c0_4, %c0_5] : memref<1x256xf32, #tpu.memory_space<vmem>>, vector<1x256xf32>
    %c240_i32 = arith.constant 240 : i32
    %6 = tpu.dynamic_rotate %4 by %c240_i32 dim 1 : vector<1x256xf32>, i32 -> vector<1x256xf32>
    %7 = arith.subf %6, %4 : vector<1x256xf32>
    %8 = math.absf %7 : vector<1x256xf32>
    %9 = arith.addf %5, %8 : vector<1x256xf32>
    %c0_6 = arith.constant 0 : index
    %c0_7 = arith.constant 0 : index
    %10 = vector.load %arg6[%c0_6, %c0_7] : memref<1x256xf32, #tpu.memory_space<vmem>>, vector<1x256xf32>
    tpu.vector_store %arg6[%c0_6, %c0_7], %9 {strides = array<i32>} : memref<1x256xf32, #tpu.memory_space<vmem>>, vector<1x256xf32>,
    %c0_8 = arith.constant 0 : index
    %c0_9 = arith.constant 0 : index
    %11 = vector.load %arg7[%c0_8, %c0_9] : memref<1x256xf32, #tpu.memory_space<vmem>>, vector<1x256xf32>
    %c255_i32 = arith.constant 255 : i32
    %12 = tpu.dynamic_rotate %4 by %c255_i32 dim 1 : vector<1x256xf32>, i32 -> vector<1x256xf32>
    %13 = arith.subf %12, %4 : vector<1x256xf32>
    %14 = math.absf %13 : vector<1x256xf32>
    %15 = arith.addf %11, %14 : vector<1x256xf32>
    %c0_10 = arith.constant 0 : index
    %c0_11 = arith.constant 0 : index
    %16 = vector.load %arg7[%c0_10, %c0_11] : memref<1x256xf32, #tpu.memory_space<vmem>>, vector<1x256xf32>
    tpu.vector_store %arg7[%c0_10, %c0_11], %15 {strides = array<i32>} : memref<1x256xf32, #tpu.memory_space<vmem>>, vector<1x256xf32>,
    %c3_i32 = arith.constant 3 : i32
    %17 = arith.cmpi eq, %arg1, %c3_i32 : i32
    %18 = arith.extui %17 : i1 to i32
    %c0_i32_12 = arith.constant 0 : i32
    %19 = arith.cmpi ne, %18, %c0_i32_12 : i32
    scf.if %19 {
      %c0_13 = arith.constant 0 : index
      %c0_14 = arith.constant 0 : index
      %20 = vector.load %arg6[%c0_13, %c0_14] : memref<1x256xf32, #tpu.memory_space<vmem>>, vector<1x256xf32>
      %c0_15 = arith.constant 0 : index
      %c0_16 = arith.constant 0 : index
      %21 = vector.load %arg7[%c0_15, %c0_16] : memref<1x256xf32, #tpu.memory_space<vmem>>, vector<1x256xf32>
      %c0_17 = arith.constant 0 : index
      %c0_18 = arith.constant 0 : index
      %22 = vector.load %arg3[%c0_17, %c0_18] : memref<4x256xbf16, #tpu.memory_space<vmem>>, vector<4x256xbf16>
      %23 = arith.extf %22 : vector<4x256xbf16> to vector<4x256xf32>
      %24 = vector.extract_strided_slice %23 {offsets = [0, 0], sizes = [1, 256], strides = [1, 1]} : vector<4x256xf32> to vector<1x256xf32>
      %25 = arith.mulf %24, %20 : vector<1x256xf32>
      %26 = vector.extract_strided_slice %23 {offsets = [1, 0], sizes = [1, 256], strides = [1, 1]} : vector<4x256xf32> to vector<1x256xf32>
      %c16_i32 = arith.constant 16 : i32
      %27 = tpu.dynamic_rotate %20 by %c16_i32 dim 1 : vector<1x256xf32>, i32 -> vector<1x256xf32>
      %28 = arith.mulf %26, %27 : vector<1x256xf32>
      %29 = arith.addf %25, %28 : vector<1x256xf32>
      %30 = vector.extract_strided_slice %23 {offsets = [2, 0], sizes = [1, 256], strides = [1, 1]} : vector<4x256xf32> to vector<1x256xf32>
      %31 = arith.mulf %30, %21 : vector<1x256xf32>
      %32 = arith.addf %29, %31 : vector<1x256xf32>
      %33 = vector.extract_strided_slice %23 {offsets = [3, 0], sizes = [1, 256], strides = [1, 1]} : vector<4x256xf32> to vector<1x256xf32>
      %c1_i32 = arith.constant 1 : i32
      %34 = tpu.dynamic_rotate %21 by %c1_i32 dim 1 : vector<1x256xf32>, i32 -> vector<1x256xf32>
      %35 = arith.mulf %33, %34 : vector<1x256xf32>
      %36 = arith.addf %32, %35 : vector<1x256xf32>
      %c0_19 = arith.constant 0 : index
      %c0_20 = arith.constant 0 : index
      %37 = memref.load %arg2[%c0_19, %c0_20] : memref<1x1xf32, #tpu.memory_space<smem>>
      %38 = vector.broadcast %37 : f32 to vector<1x256xf32>
      %39 = arith.mulf %36, %38 : vector<1x256xf32>
      %c0_21 = arith.constant 0 : index
      %c0_22 = arith.constant 0 : index
      %c0_23 = arith.constant 0 : index
      %40 = vector.load %arg5[%c0_21, %c0_22, %c0_23] : memref<1x1x256xf32, #tpu.memory_space<vmem>>, vector<1x1x256xf32>
      %41 = vector.shape_cast %40 : vector<1x1x256xf32> to vector<1x256xf32>
      %42 = vector.shape_cast %39 : vector<1x256xf32> to vector<1x1x256xf32>
      tpu.vector_store %arg5[%c0_21, %c0_22, %c0_23], %42 {strides = array<i32>} : memref<1x1x256xf32, #tpu.memory_space<vmem>>, vector<1x1x256xf32>,
    } else {
    }
    return
  }
  func.func @transform_0(%arg0: i32, %arg1: i32) -> (i32, i32) {
    %c0_i32 = arith.constant 0 : i32
    %c0_i32_0 = arith.constant 0 : i32
    %c0_i32_1 = arith.constant 0 : i32
    return %c0_i32, %c0_i32_0 : i32, i32
  }
  func.func @transform_1(%arg0: i32, %arg1: i32) -> (i32, i32) {
    %c0_i32 = arith.constant 0 : i32
    %c0_i32_0 = arith.constant 0 : i32
    %c0_i32_1 = arith.constant 0 : i32
    return %c0_i32, %c0_i32_0 : i32, i32
  }
  func.func @transform_2(%arg0: i32, %arg1: i32) -> (i32, i32, i32, i32) {
    %c0_i32 = arith.constant 0 : i32
    %c0_i32_0 = arith.constant 0 : i32
    %c0_i32_1 = arith.constant 0 : i32
    return %arg0, %arg1, %c0_i32, %c0_i32_0 : i32, i32, i32, i32
  }
  func.func @transform_3(%arg0: i32, %arg1: i32) -> (i32, i32, i32) {
    %c0_i32 = arith.constant 0 : i32
    %c0_i32_0 = arith.constant 0 : i32
    %c0_i32_1 = arith.constant 0 : i32
    return %arg0, %c0_i32, %c0_i32_0 : i32, i32, i32
  }
}

</mosaic_0001>

<bundles_post_ra>
// kernel: tpu_custom_call.1
= control target key start
LH: loop header
LB: loop body
LE: loop exit
PB: predicated region body
PF: predicated region fallthrough
CT: control target
= control target key end

     0   :  { %s1187_s0 = inlined_call_operand.<no memory space> [shape: f32[1,1], index: 0, kind: input, shape index: {}]   ;;  %s1188_s1 = inlined_call_operand.hbm [shape: bf16[4,256], index: 1, kind: input, shape index: {}]   ;;  %s1189_s2 = inlined_call_operand.hbm [shape: f32[2,4,1,256], index: 2, kind: input, shape index: {}]   ;;  %s1190_s3 = inlined_call_operand.hbm [shape: f32[2,1,256], index: 3, kind: output, shape index: {}]  }
   0x1   :  { %1201 = sst [smem:[#allocation18_spill]] %s1188_s1 }
   0x2   :  { %1202 = sst [smem:[#allocation19_spill]] %s1190_s3 }
   0x3   :  { %8 = sst [smem:[#allocation4]] %s1187_s0 }
   0x4   :  { %9 = vsyncpa [#allocation6], 0 }
   0x5   :  { %10 = vsyncpa [#allocation9], 0 }
   0x6   :  { %12 = vsyncpa [#allocation9 + $0x1], 0 }
   0x7   :  { %13 = vsyncpa [#allocation7], 0 }
   0x8   :  { %15 = vsyncpa [#allocation7 + $0x1], 0  ;;  %s892_s14 = smov 0   ;;  %s894_s15 = smov 0  }
   0x9   :  { %s896_s16 = smov 0   ;;  %s898_s17 = smov 0  }
   0xa   :  { %s900_s18 = smov 0   ;;  %s902_s19 = smov 0  }
   0xb   :  { %s904_s20 = smov 0   ;;  %s906_s0 = smov 0  }
   0xc   :  { %s908_s21 = smov 0   ;;  %s910_s22 = smov 0  }
   0xd   :  { %s912_s23 = smov 0  }
   0xe LB: > { %1203 = sst [smem:[#allocation14_spill]] %s817_s14  ;;  %s529_s24 = sadd.s32 4294967295, %s857_s23   ;;  %s857_s23 = sphi %s912_s23, %s21_s23   ;;  %s853_s22 = sphi %s910_s22, %s1237_s22   ;;  %s849_s21 = sphi %s908_s21, %s1236_s21   ;;  %s845_s0 = sphi %s906_s0, %s1235_s0   ;;  %s841_s20 = sphi %s904_s20, %s1234_s20   ;;  %s837_s19 = sphi %s902_s19, %s1233_s19   ;;  %s833_s18 = sphi %s900_s18, %s1232_s18   ;;  %s829_s17 = sphi %s898_s17, %s1231_s17   ;;  %s825_s16 = sphi %s896_s16, %s1230_s16   ;;  %s821_s15 = sphi %s894_s15, %s1229_s15   ;;  %s817_s14 = sphi %s892_s14, %s1228_s14  }
   0xf   : > { %s530_s25 = sadd.s32 4294967294, %s857_s23   ;;  %p97_p0 = scmp.ne.s32.totalorder %s833_s18, %s829_s17 }
  0x10   : > { %p948_p1 = scmp.eq.s32.totalorder %s529_s24, 0  ;;  %s110_s27 = sadd.s32 1, %s825_s16 }
  0x11   : > { %p120_p2 = scmp.ne.s32.totalorder %s825_s16, %s821_s15  ;;  %p121_p4 = scmp.eq.s32.totalorder %s529_s24, 7 }
  0x12   : > { %s1204_s26 = scalar_select %p948_p1, 1, 0 }
  0x13   : > { %p957_p3 = por %p948_p1, %p97_p0  ;;  %p126_p5 = scmp.ne.s32.totalorder %s821_s15, %s817_s14 }
  0x14   : > { %p127_p6 = scmp.eq.s32.totalorder %s530_s25, 7  ;;  %p963_p7 = por %p121_p4, %p120_p2 }
  0x15   : > { %s1205_s28 = scalar_select %p957_p3, 1, 0 }
  0x16   : > { %s1206_s29 = scalar_select %p963_p7, 1, 0 }
  0x17   : > { %p531_p8 = scmp.ge.s32.totalorder %s857_s23, 1  ;;  %p968_p9 = por %p127_p6, %p126_p5 }
  0x18   : > { %p134_p10 = scmp.lt.s32.totalorder %s857_s23, 9  ;;  %s859_s5 = smov [#allocation5]  }
  0x19   : > { %s1207_s30 = scalar_select %p968_p9, 1, 0 }
  0x1a   : > { %p973_p11 = pnand %p531_p8, %p134_p10  ;;  %s150_s6 = sshll.u32 %s859_s5, 4  ;;  %s151_s6 = int_to_ptr.vmem [resolvable:$true] %s150_s6 }
  0x1b   : > { %1208 = sst [smem:[#allocation15_spill]] %s1207_s30  ;;  %s30_s8 = sadd.s32 1, %s849_s21 }
  0x1c   : > { %s1209_s4 = scalar_select %p973_p11, 1, 0 }
  0x1d   : > { %p561_p12 = pneg %p973_p11  ;;  %s1211_s1 = sld [smem:[#allocation18_spill]] }
  0x1f   : > { %p981_p13 = pnand %p561_p12, %p948_p1 }
  0x21   : > { %p675_p2 = pneg %p981_p13 }
  0x23   : > { %s673_s11 = scalar_lea.hbm %s1211_s1, 64 }
  0x24   : > { %p674_p0 = scmp.ne.s32.totalorder %s1211_s1, %s673_s11  ;;  %p680_p6 = scmp.lt.u32.totalorder %s673_s11, %s1211_s1 }
  0x26   : > { %p676_p4 = pnand %p675_p2, %p674_p0 }
  0x28   : > { %p677_p5 = pneg %p676_p4 }
  0x2a   : > { %p682_p8 = pnand %p680_p6, %p677_p5 }
  0x2c   : > { %685 = shalt.err (!%p682_p8)
}
  0x2d   : > { %s686_s25 = scalar_lea.vmem %s151_s6, 64  ;;  %p694_p7 = scmp.lt.s32.totalorder %s151_s6, %s151_s6 }
  0x2e   : > { %p687_p10 = scmp.ne.s32.totalorder %s151_s6, %s686_s25  ;;  %p695_p3 = scmp.lt.s32.totalorder %s686_s25, %s686_s25 }
  0x30   : > { %p689_p12 = pnand %p687_p10, %p675_p2  ;;  %p696_p1 = por %p695_p3, %p694_p7 }
  0x32   : > { %p690_p9 = pneg %p689_p12 }
  0x34   : > { %p697_p11 = pnand %p696_p1, %p690_p9 }
  0x36   : > { %700 = shalt.err (!%p697_p11)
}
  0x37   : > { %564 = dma.hbm_to_vmem [thread:$0]  (!%p981_p13), %s1211_s1, 64, %s151_s6, [#allocation6]  }
  0x38   : > { %p31_p0 = scmp.ge.s32.totalorder %s30_s8, 4  ;;  %s33_s10 = sadd.s32 1, %s853_s22 }
  0x39   : > { %s84_s11 = sadd.s32 1, %s837_s19  ;;  %p91_p1 = scmp.ne.s32.totalorder %s837_s19, %s833_s18 }
  0x3a   : > { %s1239_s8 = smov (%p31_p0, %s30_s8), 0  ;;  %s1241_s10 = smov (!%p31_p0, %s33_s10), %s853_s22 }
  0x3b   : > { %1212 = sst [smem:[#allocation16_spill]] %s1239_s8  ;;  %s80_s7 = ssub.s32 %s849_s21, %s1239_s8 }
  0x3c   : > { %p92_p3 = scmp.eq.s32.totalorder %s857_s23, 0  ;;  %p35_p7 = scmp.ge.s32.totalorder %s1241_s10, 2 }
  0x3d   : > { %p574_p9 = scmp.lt.s32.totalorder %s857_s23, 8  ;;  %s161_s6 = sand.u32 1, %s837_s19  }
  0x3e   : > { %p1013_p11 = por %p92_p3, %p91_p1  ;;  %s1243_s10 = smov (%p35_p7, %s1241_s10), 0 }
  0x3f   : > { %1214 = sst [smem:[#allocation17_spill]] %s1243_s10  ;;  %s534_s13 = sshll.u32 %s161_s6, 1 }
  0x40   : > { %s79_s17 = ssub.s32 %s853_s22, %s1243_s10  ;;  %s535_s25 = sshll.u32 %s849_s21, 1 }
  0x41   : > { %s81_s24 = sor.u32 %s80_s7, %s79_s17  ;;  %p108_p13 = scmp.eq.s32.totalorder %s79_s17, 0 }
  0x42   : > { %p82_p2 = scmp.eq.s32.totalorder %s81_s24, 0  ;;  %s536_s1 = sshll.u32 %s853_s22, 3 }
  0x43   : > { %s1026_s5 = scalar_select %p108_p13, %s825_s16, %s110_s27  }
  0x44   : > { %s1029_s9 = scalar_select %p82_p2, %s837_s19, %s84_s11  }
  0x45   : > { %s165_s8 = scalar_lea.vmem [#allocation8], %s534_s13  ;;  %s171_s14 = sadd.s32 %s536_s1, %s535_s25 }
  0x46   : > { %s175_s30 = sshll.u32 %s165_s8, 4  ;;  %s537_s3 = sshll.u32 %s171_s14, 4  ;;  %s1032_s30 = int_to_ptr.vmem [resolvable:$true] %s175_s30 }
  0x47   : > { %p1038_p4 = pnand %p574_p9, %p1013_p11  ;;  %s1045_s27 = scalar_lea.hbm %s1189_s2, %s537_s3 }
  0x48   : > { %s162_s1 = scalar_lea.sflag [#allocation9], %s161_s6  ;;  %s701_s8 = scalar_lea.hbm %s1045_s27, 32 }
  0x49   : > { %p702_p5 = scmp.ne.s32.totalorder %s1045_s27, %s701_s8  ;;  %p703_p6 = pneg %p1038_p4 }
  0x4a   : > { %s706_s12 = scalar_lea.hbm %s1189_s2, 256  ;;  %p707_p12 = scmp.lt.u32.totalorder %s1045_s27, %s1189_s2 }
  0x4b   : > { %p704_p8 = pnand %p703_p6, %p702_p5  ;;  %p708_p0 = scmp.lt.u32.totalorder %s706_s12, %s701_s8 }
  0x4c   : > { %p710_p3 = scmp.lt.u32.totalorder %s701_s8, %s1045_s27 }
  0x4d   : > { %p705_p10 = pneg %p704_p8  ;;  %p709_p1 = por %p708_p0, %p707_p12 }
  0x4f   : > { %p711_p7 = por %p710_p3, %p709_p1 }
  0x51   : > { %p712_p9 = pnand %p711_p7, %p705_p10 }
  0x53   : > { %715 = shalt.err (!%p712_p9)
}
  0x54   : > { %s716_s6 = scalar_lea.vmem %s1032_s30, 32  ;;  %s860_s24 = smov [#allocation8]  }
  0x55   : > { %p717_p11 = scmp.ne.s32.totalorder %s1032_s30, %s716_s6  ;;  %s721_s25 = sshll.u32 %s860_s24, 4  ;;  %s722_s25 = int_to_ptr.vmem [resolvable:$false] %s721_s25 }
  0x56   : > { %s723_s7 = scalar_lea.vmem %s722_s25, 64  ;;  %p724_p5 = scmp.lt.s32.totalorder %s1032_s30, %s722_s25 }
  0x57   : > { %p719_p13 = pnand %p717_p11, %p703_p6  ;;  %p725_p8 = scmp.lt.s32.totalorder %s723_s7, %s716_s6 }
  0x59   : > { %p720_p2 = pneg %p719_p13  ;;  %p726_p12 = por %p725_p8, %p724_p5 }
  0x5b   : > { %p727_p0 = pnand %p726_p12, %p720_p2 }
  0x5d   : > { %730 = shalt.err (!%p727_p0)
}
  0x5e   : > { %568 = dma.hbm_to_vmem [thread:$0]  (!%p1038_p4), %s1045_s27, 32, %s1032_s30, %s162_s1  }
  0x5f   : > { %p1216_p10 = scmp.ne.s32.totalorder %s1209_s4, 0 }
  0x60   : > { %p1217_p6 = scmp.ne.s32.totalorder (!%p1216_p10), %s1204_s26, 0 }
  0x61   : > { %184 = sbr.rel (%p1216_p10) target bundleno = 436 (0x1b4), region = 32 }
  0x68   : > { %804 = dma.done.wait (%p1217_p6), [#allocation6], 64  }
  0x69   : > { %806 = vsyncadd (%p1217_p6), [#allocation6], 4294967232  ;;  %s190_s17 = sand.u32 1, %s833_s18   ;;  %p1218_p1 = scmp.ne.s32.totalorder %s1205_s28, 0 }
  0x6a   : > { %s540_s8 = sshll.u32 %s190_s17, 1  ;;  %s191_s14 = scalar_lea.sflag [#allocation9], %s190_s17 }
  0x6b   : > { %s194_s11 = scalar_lea.vmem [#allocation8], %s540_s8 }
  0x6c   : > { %808 = dma.done.wait (%p1218_p1), %s191_s14, 32  }
  0x6d   : > { %810 = vsyncadd (%p1218_p1), %s191_s14, 4294967264  ;;  %s214_s30 = sand.u32 1, %s821_s15   ;;  %p542_p4 = scmp.ne.s32.totalorder %s841_s20, 0 }
  0x6e   : > { %s1086_s4 = sshll.u32 %s214_s30, 1  ;;  %v221_v0 = vlaneseq (!%p542_p4)  ;;  %v861_v1 = vmov (!%p542_p4), 0.0  }
  0x6f   : > { %s216_s26 = scalar_lea.vmem [#allocation10], %s1086_s4  ;;  %220 = sbr.rel (%p542_p4) target bundleno = 118 (0x76), region = 44 }
  0x70   : > { %vm223_vm0 = vcmp.lt.s32.totalorder (!%p542_p4), %v221_v0, 256 }
  0x71   : > { %225 = vst.msk [vmem:[#allocation2] sm:$0x3] (!%p542_p4), %vm223_vm0, %v861_v1  ;;  %226 = vst.msk [vmem:[#allocation3] sm:$0x3] (!%p542_p4), %vm223_vm0, %v861_v1 }
  0x76 PF: > { %v230_v2 = vlaneseq  ;;  %v227_v4 = vld [vmem:[%s194_s11] sm:$0x3]  ;;  %s862_s28 = smov 127   ;;  %s863_s10 = smov 112   ;;  %v864_v12 = vmov 1966171168  }
  0x77   : > { %v257_v13 = vunpack.c.l.s4 %v864_v12  ;;  %p543_p3 = scmp.ne.s32.totalorder %s841_s20, 3 }
  0x78   : > { %v1090_v3 = vshrl.u32 %v230_v2, 7  ;;  %v1094_v9 = vand.u32 127, %v230_v2  ;;  %v277_v33 = vld [vmem:[#allocation3] sm:$0x3]  ;;  %v228_v36 = vld [vmem:[#allocation2] sm:$0x3] }
  0x79   : > { %v258_v14 = vunpack.c.0.s8 %v257_v13  ;;  %vm1104_vm3 = vcmp.lt.s32.totalorder %v230_v2, 256  ;;  %s865_s27 = smov (!%p543_p3), 1   ;;  %s866_s1 = smov (!%p543_p3), 16   ;;  %v867_v47 = vmov (!%p543_p3), 286326784   ;;  %v315_v53 = vld [vmem:[#allocation5] sm:$0xf] (!%p543_p3) }
  0x7a   : > { %v232_v5 = vsub.s32 0, %v1090_v3  ;;  %v236_v6 = vsub.s32 1, %v1090_v3  ;;  %vm282_vm1 = vcmp.lt.s32.totalorder %v1094_v9, 127  ;;  %vm246_vm2 = vcmp.lt.s32.totalorder %v1094_v9, 112  ;;  %s398_s20 = sld [smem:[#allocation4]] (!%p543_p3) }
  0x7b   : > { %v1099_v25 = vsub.s32 %v258_v14, %v1090_v3  ;;  %v319_v48 = vunpack.c.l.s4 (!%p543_p3), %v867_v47  ;;  %vm384_vm4 = vcmp.lt.s32.totalorder (!%p543_p3), %v1094_v9, 1  ;;  %vm341_vm5 = vcmp.lt.s32.totalorder (!%p543_p3), %v1094_v9, 16 }
  0x7c   : > { %v233_v7 = vrot.slane %v227_v4, %v232_v5  ;;  %v237_v8 = vrot.slane %v227_v4, %v236_v6  ;;  %v316_v62 = vunpack.c.l.bf16 (!%p543_p3), %v315_v53 }
  0x7d   : > { %v320_v49 = vunpack.c.0.s8 (!%p543_p3), %v319_v48 }
  0x7e   : > { %278 = vrot.lane.b32.xlu1 %v233_v7, %s862_s28  ;;  %240 = vrot.lane.b32.xlu0 %v233_v7, %s863_s10 }
  0x7f   : > { %v323_v51 = vsub.s32 (!%p543_p3), %v320_v49, %v1090_v3 }
  0x80   : > { %v399_v12 = vstv (!%p543_p3), %s398_s20 }
  0x82   : > { %280 = vrot.lane.b32.xlu1 %v237_v8, %s862_s28  ;;  %242 = vrot.lane.b32.xlu0 %v237_v8, %s863_s10 }
  0xf0   : > { %v279_v10 = vpop.permute.xlu1 %278  ;;  %v241_v11 = vpop.permute.xlu0 %240 }
  0xf4   : > { %v281_v15 = vpop.permute.xlu1 %280  ;;  %v243_v16 = vpop.permute.xlu0 %242 }
  0xf5   : > { %v283_v17 = vsel %vm282_vm1, %v279_v10, %v281_v15  ;;  %v284_v18 = vsel %vm282_vm1, %v281_v15, %v279_v10  ;;  %v247_v19 = vsel %vm246_vm2, %v241_v11, %v243_v16  ;;  %v248_v20 = vsel %vm246_vm2, %v243_v16, %v241_v11 }
  0xf6   : > { %v285_v21 = vsub.f32 %v283_v17, %v233_v7  ;;  %v286_v22 = vsub.f32 %v284_v18, %v237_v8  ;;  %v249_v23 = vsub.f32 %v247_v19, %v233_v7  ;;  %v250_v24 = vsub.f32 %v248_v20, %v237_v8 }
  0xf8   : > { %v287_v26 = vand.u32 2147483647, %v285_v21  ;;  %v288_v27 = vand.u32 2147483647, %v286_v22  ;;  %v251_v28 = vand.u32 2147483647, %v249_v23 }
  0xf9   : > { %v252_v29 = vand.u32 2147483647, %v250_v24 }
  0xfa   : > { %v291_v30 = vcombine.low %v287_v26, %v288_v27 }
  0xfb   : > { %v255_v31 = vcombine.low %v251_v28, %v252_v29 }
  0xfc   : > { %v298_v32 = vrot.slane %v291_v30, %v1099_v25 }
  0xfd   : > { %v262_v34 = vrot.slane %v255_v31, %v1099_v25  ;;  %312 = sbr.rel (%p543_p3) target bundleno = 410 (0x19a), region = 48 }
  0xfe   : > { %v305_v35 = vrot.slane %v298_v32, %v1099_v25 }
  0xff   : > { %v269_v38 = vrot.slane %v262_v34, %v1099_v25 }
 0x100   : > { %v307_v39 = vadd.f32 %v305_v35, %v277_v33 }
 0x101   : > { %v271_v40 = vadd.f32 %v269_v38, %v228_v36 }
 0x102   : > { %308 = vst.msk [vmem:[#allocation3] sm:$0x3] %vm1104_vm3, %v307_v39 }
 0x103   : > { %276 = vst.msk [vmem:[#allocation2] sm:$0x3] %vm1104_vm3, %v271_v40 }
 0x109   : > { %v314_v41 = vld [vmem:[#allocation3] sm:$0x3] }
 0x10a   : > { %v373_v42 = vrot.slane %v314_v41, %v232_v5  ;;  %v313_v43 = vld [vmem:[#allocation2] sm:$0x3]  ;;  %v377_v45 = vrot.slane %v314_v41, %v236_v6  ;;  %v362_v55 = vrot.slane %v314_v41, %v323_v51 }
 0x10b   : > { %v330_v44 = vrot.slane %v313_v43, %v232_v5  ;;  %v334_v46 = vrot.slane %v313_v43, %v236_v6  ;;  %v324_v63 = vrot.slane %v313_v43, %v323_v51 }
 0x10c   : > { %380 = vrot.lane.b32.xlu1 %v373_v42, %s865_s27  ;;  %v364_v1 = vmul.f32 %v362_v55, %v316_v62 }
 0x10d   : > { %337 = vrot.lane.b32.xlu0 %v330_v44, %s866_s1  ;;  %v326_v4 = vmul.f32 %v324_v63, %v316_v62 }
 0x10e   : > { %v545_v6 = vrot.slane %v364_v1, 10 }
 0x110   : > { %382 = vrot.lane.b32.xlu1 %v377_v45, %s865_s27 }
 0x111   : > { %339 = vrot.lane.b32.xlu0 %v334_v46, %s866_s1 }
 0x17e   : > { %v381_v50 = vpop.permute.xlu1 %380 }
 0x17f   : > { %v338_v52 = vpop.permute.xlu0 %337 }
 0x182   : > { %v383_v54 = vpop.permute.xlu1 %382 }
 0x183   : > { %v385_v56 = vsel %vm384_vm4, %v381_v50, %v383_v54  ;;  %v386_v57 = vsel %vm384_vm4, %v383_v54, %v381_v50  ;;  %v340_v58 = vpop.permute.xlu0 %339 }
 0x184   : > { %v389_v59 = vcombine.low %v386_v57, %v385_v56  ;;  %v342_v60 = vsel %vm341_vm5, %v338_v52, %v340_v58  ;;  %v343_v61 = vsel %vm341_vm5, %v340_v58, %v338_v52 }
 0x185   : > { %v346_v0 = vcombine.low %v343_v61, %v342_v60 }
 0x186   : > { %v390_v2 = vrot.slane %v389_v59, 5 }
 0x187   : > { %v347_v3 = vrot.slane %v346_v0, 7 }
 0x188   : > { %v392_v7 = vmul.f32 %v390_v2, %v316_v62 }
 0x189   : > { %v349_v5 = vmul.f32 %v347_v3, %v316_v62 }
 0x18a   : > { %v546_v10 = vrot.slane %v392_v7, 11 }
 0x18b   : > { %v544_v8 = vrot.slane %v349_v5, 9 }
 0x18d   : > { %v354_v9 = vadd.f32 %v544_v8, %v326_v4 }
 0x18f   : > { %v369_v11 = vadd.f32 %v545_v6, %v354_v9 }
 0x191   : > { %v397_v13 = vadd.f32 %v546_v10, %v369_v11 }
 0x193   : > { %v400_v14 = vmul.f32 %v399_v12, %v397_v13 }
 0x195   : > { %v408_v15 = vrot.slane %v400_v14, %v1099_v25 }
 0x197   : > { %v415_v16 = vrot.slane %v408_v15, %v1099_v25 }
 0x199   : > { %417 = vst.msk [vmem:[%s216_s26] sm:$0x3] %vm1104_vm3, %v415_v16 }
 0x19a PF: > { %s552_s12 = sshll.u32 %s845_s0, 5  ;;  %s1221_s6 = sld [smem:[#allocation19_spill]] }
 0x19b   : > { %s433_s25 = sshll.u32 %s216_s26, 4  ;;  %s419_s7 = scalar_lea.sflag [#allocation7], %s214_s30  ;;  %s434_s25 = int_to_ptr.vmem [resolvable:$true] %s433_s25 }
 0x19c   : > { %s731_s17 = scalar_lea.vmem %s434_s25, 32  ;;  %p1222_p9 = scmp.ne.s32.totalorder %s1206_s29, 0 }
 0x19d   : > { %p732_p7 = scmp.ne.s32.totalorder %s434_s25, %s731_s17  ;;  %s868_s8 = smov [#allocation10]  }
 0x19e   : > { %s735_s14 = sshll.u32 %s868_s8, 4  ;;  %s736_s14 = int_to_ptr.vmem [resolvable:$false] %s735_s14 }
 0x19f   : > { %p733_p11 = pnand %p732_p7, %p1222_p9  ;;  %s737_s11 = scalar_lea.vmem %s736_s14, 64 }
 0x1a0   : > { %s1127_s24 = scalar_lea.hbm %s1221_s6, %s552_s12  ;;  %p738_p2 = scmp.lt.s32.totalorder %s434_s25, %s736_s14 }
 0x1a1   : > { %p734_p13 = pneg %p733_p11  ;;  %p739_p5 = scmp.lt.s32.totalorder %s737_s11, %s731_s17 }
 0x1a3   : > { %p740_p8 = por %p739_p5, %p738_p2 }
 0x1a5   : > { %p741_p12 = pnand %p740_p8, %p734_p13 }
 0x1a7   : > { %744 = shalt.err (!%p741_p12)
}
 0x1a8   : > { %s745_s0 = scalar_lea.hbm %s1127_s24, 32  ;;  %s749_s26 = scalar_lea.hbm %s1221_s6, 64 }
 0x1a9   : > { %p746_p0 = scmp.ne.s32.totalorder %s1127_s24, %s745_s0  ;;  %p750_p1 = scmp.lt.u32.totalorder %s1127_s24, %s1221_s6 }
 0x1aa   : > { %p751_p4 = scmp.lt.u32.totalorder %s749_s26, %s745_s0  ;;  %p753_p7 = scmp.lt.u32.totalorder %s745_s0, %s1127_s24 }
 0x1ab   : > { %p747_p10 = pnand %p746_p0, %p1222_p9 }
 0x1ac   : > { %p752_p3 = por %p751_p4, %p750_p1 }
 0x1ad   : > { %p748_p6 = pneg %p747_p10 }
 0x1ae   : > { %p754_p11 = por %p753_p7, %p752_p3 }
 0x1b0   : > { %p755_p13 = pnand %p754_p11, %p748_p6 }
 0x1b2   : > { %758 = shalt.err (!%p755_p13)
}
 0x1b3   : > { %559 = dma.vmem_to_hbm [thread:$0]  (%p1222_p9), %s434_s25, 32, %s1127_s24, %s419_s7  }
 0x1b4 PF: > { %s1223_s27 = sld [smem:[#allocation14_spill]]  ;;  %s1224_s1 = sld [smem:[#allocation15_spill]] }
 0x1b5   : > { %p576_p2 = scmp.ge.s32.totalorder %s857_s23, 2 }
 0x1ba   : > { %s445_s20 = sand.u32 1, %s1223_s27   ;;  %p1225_p5 = scmp.ne.s32.totalorder %s1224_s1, 0 }
 0x1bb   : > { %s446_s12 = scalar_lea.sflag [#allocation7], %s445_s20 }
 0x1bc   : > { %p570_p8 = pnand %p576_p2, %p1225_p5 }
 0x1be   : > { %812 = dma.done.wait (!%p570_p8), %s446_s12, 32  }
 0x1bf   : > { %814 = vsyncadd (!%p570_p8), %s446_s12, 4294967264  ;;  %s21_s23 = sadd.s32 1, %s857_s23   ;;  %s1226_s29 = sld [smem:[#allocation16_spill]] }
 0x1c0   : > { %p18_p12 = scmp.ge.s32.totalorder %s21_s23, 10   ;;  %s1227_s13 = sld [smem:[#allocation17_spill]] }
 0x1c1   : > { %s1228_s14 = smov %s821_s15  ;;  %s1229_s15 = smov %s825_s16 }
 0x1c2   : > { %s1230_s16 = smov %s1026_s5  ;;  %s1231_s17 = smov %s833_s18 }
 0x1c3   : > { %s1232_s18 = smov %s837_s19  ;;  %s1233_s19 = smov %s1029_s9 }
 0x1c4   : > { %s1234_s20 = smov %s849_s21  ;;  %s1235_s0 = smov %s853_s22 }
 0x1c5   : > { %s1236_s21 = smov %s1226_s29  ;;  %20 = sbr.rel (!%p18_p12) target bundleno = 14 (0xe), region = 90 }
 0x1c6   : > { %s1237_s22 = smov %s1227_s13 }
 0x1cc   :  { %451 = vsyncpa [#allocation6], 1 }
 0x1cd   :  { %453 = vsyncpa [#allocation6 + $0x1], 1 }
 0x1ce   :  { %454 = vsyncpa [#allocation9], 1 }
 0x1cf   :  { %456 = vsyncpa [#allocation9 + $0x1], 1 }
 0x1d0   :  { %457 = vsyncpa [#allocation7], 1 }
 0x1d1   :  { %459 = vsyncpa [#allocation7 + $0x1], 1 }

</bundles_post_ra>
